<compile_context>
chip_gen: v7x
topology: tpu7x:2x2x1
jax: 0.10.0
libtpu: 0.0.40
codegen_flags: <defaults>
</compile_context>

<pallas_src>
import numpy as np
import jax
import jax.numpy as jnp
from jax.experimental import pallas as pl
from jax.experimental.pallas import tpu as pltpu


# ----------------------- sincos pos-embed (numpy, matches PyTorch module) ---
def get_1d_sincos_pos_embed_from_grid(embed_dim, pos):
    if embed_dim % 2 != 0:
        raise ValueError("embed_dim must be divisible by 2")
    omega = np.arange(embed_dim // 2, dtype=np.float64)
    omega /= embed_dim / 2.0
    omega = 1.0 / 10000 ** omega
    pos = pos.reshape(-1)
    out = np.einsum("m,d->md", pos, omega)
    emb_sin = np.sin(out)
    emb_cos = np.cos(out)
    return np.concatenate([emb_sin, emb_cos], axis=1)


def get_2d_sincos_pos_embed_from_grid(embed_dim, grid):
    if embed_dim % 2 != 0:
        raise ValueError("embed_dim must be divisible by 2")
    emb_h = get_1d_sincos_pos_embed_from_grid(embed_dim // 2, grid[0])
    emb_w = get_1d_sincos_pos_embed_from_grid(embed_dim // 2, grid[1])
    return np.concatenate([emb_h, emb_w], axis=1)


def get_2d_sincos_pos_embed(embed_dim, grid_size):
    grid_h = np.arange(grid_size, dtype=np.float32)
    grid_w = np.arange(grid_size, dtype=np.float32)
    grid = np.meshgrid(grid_w, grid_h)
    grid = np.stack(grid, axis=0)
    grid = grid.reshape([2, 1, grid_size, grid_size])
    return get_2d_sincos_pos_embed_from_grid(embed_dim, grid)


def _round_up(x, m):
    return (x + m - 1) // m * m


# ----------------------------------------------------------- Pallas kernel --
def _make_patch_embed_kernel(tile_m, pos_resident):
    def kernel(p_ref, w_ref, pos_ref, o_ref):
        # p_ref:   (tile_m, K_pad)   row tile of flattened patches (compute dtype)
        # w_ref:   (K_pad, D_pad)    projection weight (compute dtype)
        # pos_ref: resident -> (pos_rows, D_pad) f32, whole thing VMEM-resident
        #          streamed -> (tile_m, D_pad)   per-tile slice (bf16/f32)
        # o_ref:   (tile_m, D_pad)   output tile
        acc = jnp.dot(p_ref[...], w_ref[...],
                      preferred_element_type=jnp.float32)
        if pos_resident:
            pos_rows = pos_ref.shape[0]
            if pos_rows == tile_m:
                pos = pos_ref[...]
            else:
                n_blk = pos_rows // tile_m
                start = pl.multiple_of(
                    (pl.program_id(0) % n_blk) * tile_m, tile_m)
                pos = pos_ref[pl.ds(start, tile_m), :]
        else:
            pos = pos_ref[...]
        o_ref[...] = (acc + pos.astype(jnp.float32)).astype(o_ref.dtype)
    return kernel


# ----------------------------------------------------------------- wrapper --
def patch_embed_forward(x_nchw, weight, bias, pos_embed, patch_size, *,
                        compute_dtype=jnp.bfloat16, out_dtype=None,
                        row_tile_target=1024, fuse_patchify=True,
                        pos_resident_bytes=4 * 1024 * 1024):
    """x_nchw: [B, C, H, W]  ->  [B, Np, D]

    compute_dtype   : dtype fed to the MXU (bf16 default; f32 for exact checks).
    out_dtype       : output dtype; defaults to bf16 on the bf16 MXU path,
                      otherwise to x's dtype.
    row_tile_target : rows per MXU matmul.  1024-2048 is best on v7x/v6e
                      (per-step pipeline overhead dominates at small tiles,
                      VMEM is not binding); 512-1024 is fine on v5e.
                      Rounded up to a multiple of 16.
    fuse_patchify   : let XLA fuse the patch-extraction transpose into the
                      pallas input (skips one HBM pass).  A/B per chip
                      generation: the fused producer reads x in short strided
                      runs, which can cost more than the saved pass at
                      v6e/v7x bandwidths.
    pos_resident_bytes : keep the bias-folded positional embedding fully
                      VMEM-resident in f32 if it fits this budget; otherwise
                      stream it per tile (bf16 on the bf16 path).
    """
    B, C, H, W = x_nchw.shape
    p = patch_size
    Hp, Wp = H // p, W // p
    Np = Hp * Wp
    D = weight.shape[0]
    K = C * p * p
    compute_is_bf16 = np.dtype(compute_dtype) == np.dtype(jnp.bfloat16)
    if out_dtype is None:
        out_dtype = jnp.bfloat16 if compute_is_bf16 else x_nchw.dtype

    # ---- glue: extract non-overlapping patches in conv order (c, kh, kw) ----
    # (If the caller can supply NHWC the inner contiguous run becomes p*C
    #  elements instead of p; kept NCHW here to match the Conv2d module spec.)
    patches = x_nchw.reshape(B, C, Hp, p, Wp, p)
    patches = jnp.transpose(patches, (0, 2, 4, 1, 3, 5)).reshape(B, Np, K)

    # ---- row-tiling: fold (B, Np) into one padded row axis ------------------
    row_tile_target = max(16, _round_up(int(row_tile_target), 16))
    Np8 = _round_up(Np, 8)
    if Np8 <= row_tile_target:
        # Fold several batch elements into one tile (tile_m = reps * Np8),
        # but keep the grid at >= 2 steps so both v7x TensorCores get work.
        reps = max(1, row_tile_target // Np8)
        if B >= 2:
            reps = max(1, min(reps, B // 2))
        reps = min(reps, B)
        tile_m = Np8 * reps
        B_pad = _round_up(B, reps)
        Np_pad = Np8
    else:
        # Np itself is large: split it into row_tile_target-row chunks.
        tile_m = row_tile_target
        Np_pad = _round_up(Np, tile_m)
        B_pad = B
    R_pad = B_pad * Np_pad
    D_pad = _round_up(D, 128)          # lane-dense output stores
    K_pad = _round_up(K, 128)          # lane/sublane-aligned MXU operands

    patches = jnp.pad(patches,
                      ((0, B_pad - B), (0, Np_pad - Np), (0, K_pad - K)))
    patches_2d = patches.reshape(R_pad, K_pad).astype(compute_dtype)

    # Conv2d weight [D, C, p, p] -> matmul weight [K_pad, D_pad].
    w_mat = weight.reshape(D, K).T
    w_mat = jnp.pad(w_mat, ((0, K_pad - K), (0, D_pad - D))).astype(compute_dtype)

    # Fold bias into the positional embedding (both constants), keep f32.
    posb = pos_embed.reshape(Np, D).astype(jnp.float32) \
        + bias.reshape(1, D).astype(jnp.float32)
    posb = jnp.pad(posb, ((0, Np_pad - Np), (0, D_pad - D)))
    if tile_m >= Np_pad:
        # One tile spans whole batch element(s): pre-tile pos to (tile_m, D_pad).
        posb = jnp.tile(posb, (tile_m // Np_pad, 1))
    pos_rows = posb.shape[0]
    n_pos_blocks = pos_rows // tile_m     # pos period in units of row tiles

    # Positional embedding: VMEM-resident f32 if it fits, else streamed bf16.
    pos_resident = pos_rows * D_pad * 4 <= pos_resident_bytes
    if pos_resident:
        pos_spec = pl.BlockSpec((pos_rows, D_pad), lambda t: (0, 0))
        pos_nbytes = pos_rows * D_pad * 4
    else:
        posb = posb.astype(jnp.bfloat16 if compute_is_bf16 else jnp.float32)
        pos_spec = pl.BlockSpec((tile_m, D_pad),
                                lambda t: (t % n_pos_blocks, 0))
        pos_nbytes = 2 * tile_m * D_pad * np.dtype(posb.dtype).itemsize

    grid = (R_pad // tile_m,)
    kernel = _make_patch_embed_kernel(tile_m, pos_resident)

    # VMEM budget: double-buffered patches + output, weight (<=2 buffers),
    # pos as above, + 8 MiB headroom; clamp to 64 MiB (v7x per-TC size).
    cbytes = np.dtype(compute_dtype).itemsize
    obytes = np.dtype(out_dtype).itemsize
    vmem_est = (2 * tile_m * K_pad * cbytes
                + 2 * K_pad * D_pad * cbytes
                + 2 * tile_m * D_pad * obytes
                + pos_nbytes)
    vmem_limit = int(min(64 * 1024 * 1024,
                         max(32 * 1024 * 1024, vmem_est + 8 * 1024 * 1024)))

    def _call(weight_spec):
        return pl.pallas_call(
            kernel,
            out_shape=jax.ShapeDtypeStruct((R_pad, D_pad), out_dtype),
            grid_spec=pltpu.PrefetchScalarGridSpec(
                num_scalar_prefetch=0,
                grid=grid,
                in_specs=[
                    pl.BlockSpec((tile_m, K_pad), lambda t: (t, 0)),
                    weight_spec,
                    pos_spec,
                ],
                out_specs=pl.BlockSpec((tile_m, D_pad), lambda t: (t, 0)),
            ),
            compiler_params=pltpu.CompilerParams(
                dimension_semantics=("parallel",),
                vmem_limit_bytes=vmem_limit,
                # Let XLA fuse the patch-extraction transpose/cast into the
                # pallas input instead of a separate HBM pass (A/B per chip).
                allow_input_fusion=[bool(fuse_patchify), False, False],
            ),
        )(patches_2d, w_mat, posb)

    # Weight index map is constant -> single-buffer it (returns the second
    # buffer's VMEM to the row tile).  Fall back to the default double-buffered
    # spec if this jax build rejects pipeline_mode on a top-level BlockSpec.
    try:
        out = _call(pl.BlockSpec((K_pad, D_pad), lambda t: (0, 0),
                                 pipeline_mode=pl.Buffered(1)))
    except Exception:
        out = _call(pl.BlockSpec((K_pad, D_pad), lambda t: (0, 0)))

    out = out.reshape(B_pad, Np_pad, D_pad)
    if (B_pad, Np_pad, D_pad) != (B, Np, D):
        # NOTE: for padded shapes this slice is an extra output-sized copy;
        # consumers that accept the padded layout should take `out` directly.
        out = out[:B, :Np, :D]
    return out


# ----------------------------------------------------------------- driver ---
if __name__ == "__main__":
    # Small shapes consistent with the module.
    B, C, H, W = 2, 4, 16, 16
    patch_size = 4
    embed_dim = 32
    Hp, Wp = H // patch_size, W // patch_size
    Np = Hp * Wp                      # 16 patches (perfect square -> grid_size=4)

    key = jax.random.PRNGKey(0)
    kx, kw, kb = jax.random.split(key, 3)

    x = jax.random.normal(kx, (B, C, H, W), dtype=jnp.float32)
    # Deterministic Conv2d parameters (shape as in nn.Conv2d(in_ch, D, p, stride=p)).
    weight = jax.random.normal(kw, (embed_dim, C, patch_size, patch_size),
                               dtype=jnp.float32) * 0.02
    bias = jax.random.normal(kb, (embed_dim,), dtype=jnp.float32) * 0.02

    pos_np = get_2d_sincos_pos_embed(embed_dim, int(Np ** 0.5)).astype(np.float32)
    pos_embed = jnp.asarray(pos_np)                    # (Np, D)

    # Reference (plain JAX, f32): strided conv == patch matmul.
    patches_ref = x.reshape(B, C, Hp, patch_size, Wp, patch_size)
    patches_ref = jnp.transpose(patches_ref, (0, 2, 4, 1, 3, 5)).reshape(B, Np, -1)
    ref = jnp.einsum("bnk,dk->bnd", patches_ref, weight.reshape(embed_dim, -1),
                     precision=jax.lax.Precision.HIGHEST) + bias[None, None, :]
    ref = ref + pos_embed[None, :, :]
    ref = np.asarray(ref)

    # 1) Exact-path check (f32 MXU inputs, f32 output).
    out_f32 = patch_embed_forward(x, weight, bias, pos_embed, patch_size,
                                  compute_dtype=jnp.float32)
    out_f32 = jax.block_until_ready(out_f32)
    assert out_f32.shape == (B, Np, embed_dim)
    np.testing.assert_allclose(np.asarray(out_f32), ref, rtol=1e-4, atol=1e-4)

    # 2) Performance path (bf16 MXU inputs, f32 accumulate/epilogue, bf16 out).
    out_bf16 = patch_embed_forward(x, weight, bias, pos_embed, patch_size)
    out_bf16 = jax.block_until_ready(out_bf16)
    assert out_bf16.shape == (B, Np, embed_dim)
    np.testing.assert_allclose(np.asarray(out_bf16).astype(np.float32), ref,
                               rtol=2e-2, atol=2e-2)

    print("KERNEL_OK")
</pallas_src>

<mosaic_0001>
module attributes {stable_mosaic.version = 11 : i64} {
  func.func @kernel(%arg0: i32, %arg1: memref<16x128xf32, #tpu.memory_space<vmem>>, %arg2: memref<128x128xf32, #tpu.memory_space<vmem>>, %arg3: memref<16x128xf32, #tpu.memory_space<vmem>>, %arg4: memref<16x128xf32, #tpu.memory_space<vmem>>) attributes {dimension_semantics = [#tpu.dimension_semantics<parallel>], iteration_bounds = array<i64: 2>, scalar_prefetch = 0 : i64, scratch_operands = 0 : i64, tpu.core_type = #tpu.core_type<tc>, window_params = [{transform_indices = @transform_0, window_bounds = array<i64: 16, 128>}, {pipeline_mode = #tpu.pipeline_mode<synchronous>, transform_indices = @transform_1, window_bounds = array<i64: 128, 128>}, {pipeline_mode = #tpu.pipeline_mode<synchronous>, transform_indices = @transform_2, window_bounds = array<i64: 16, 128>}, {transform_indices = @transform_3, window_bounds = array<i64: 16, 128>}]} {
    %c0 = arith.constant 0 : index
    %c0_0 = arith.constant 0 : index
    %0 = vector.load %arg1[%c0, %c0_0] : memref<16x128xf32, #tpu.memory_space<vmem>>, vector<16x128xf32>
    %c0_1 = arith.constant 0 : index
    %c0_2 = arith.constant 0 : index
    %1 = vector.load %arg2[%c0_1, %c0_2] : memref<128x128xf32, #tpu.memory_space<vmem>>, vector<128x128xf32>
    %cst = arith.constant dense<0.000000e+00> : vector<16x128xf32>
    %2 = tpu.matmul %0, %1, %cst {dimension_numbers = #tpu.dot_dimension_numbers<[1], [0], [0], [1], [0, 0, 1, 1], [], []>} : vector<16x128xf32>, vector<128x128xf32>, vector<16x128xf32> -> vector<16x128xf32>
    %c0_3 = arith.constant 0 : index
    %c0_4 = arith.constant 0 : index
    %3 = vector.load %arg3[%c0_3, %c0_4] : memref<16x128xf32, #tpu.memory_space<vmem>>, vector<16x128xf32>
    %4 = arith.addf %2, %3 : vector<16x128xf32>
    %c0_5 = arith.constant 0 : index
    %c0_6 = arith.constant 0 : index
    %5 = vector.load %arg4[%c0_5, %c0_6] : memref<16x128xf32, #tpu.memory_space<vmem>>, vector<16x128xf32>
    tpu.vector_store %arg4[%c0_5, %c0_6], %4 {strides = array<i32>} : memref<16x128xf32, #tpu.memory_space<vmem>>, vector<16x128xf32>,
    return
  }
  func.func @transform_0(%arg0: i32) -> (i32, i32) {
    %c0_i32 = arith.constant 0 : i32
    %c0_i32_0 = arith.constant 0 : i32
    return %arg0, %c0_i32 : i32, i32
  }
  func.func @transform_1(%arg0: i32) -> (i32, i32) {
    %c0_i32 = arith.constant 0 : i32
    %c0_i32_0 = arith.constant 0 : i32
    %c0_i32_1 = arith.constant 0 : i32
    return %c0_i32, %c0_i32_0 : i32, i32
  }
  func.func @transform_2(%arg0: i32) -> (i32, i32) {
    %c0_i32 = arith.constant 0 : i32
    %c0_i32_0 = arith.constant 0 : i32
    %c0_i32_1 = arith.constant 0 : i32
    return %c0_i32, %c0_i32_0 : i32, i32
  }
  func.func @transform_3(%arg0: i32) -> (i32, i32) {
    %c0_i32 = arith.constant 0 : i32
    %c0_i32_0 = arith.constant 0 : i32
    return %arg0, %c0_i32 : i32, i32
  }
}

module attributes {stable_mosaic.version = 11 : i64} {
  func.func @kernel(%arg0: i32, %arg1: memref<16x128xf32, #tpu.memory_space<vmem>>, %arg2: memref<128x128xf32, #tpu.memory_space<vmem>>, %arg3: memref<16x128xf32, #tpu.memory_space<vmem>>, %arg4: memref<16x128xf32, #tpu.memory_space<vmem>>) attributes {dimension_semantics = [#tpu.dimension_semantics<parallel>], iteration_bounds = array<i64: 2>, scalar_prefetch = 0 : i64, scratch_operands = 0 : i64, tpu.core_type = #tpu.core_type<tc>, window_params = [{transform_indices = @transform_0, window_bounds = array<i64: 16, 128>}, {pipeline_mode = #tpu.pipeline_mode<synchronous>, transform_indices = @transform_1, window_bounds = array<i64: 128, 128>}, {pipeline_mode = #tpu.pipeline_mode<synchronous>, transform_indices = @transform_2, window_bounds = array<i64: 16, 128>}, {transform_indices = @transform_3, window_bounds = array<i64: 16, 128>}]} {
    %c0 = arith.constant 0 : index
    %c0_0 = arith.constant 0 : index
    %0 = vector.load %arg1[%c0, %c0_0] : memref<16x128xf32, #tpu.memory_space<vmem>>, vector<16x128xf32>
    %c0_1 = arith.constant 0 : index
    %c0_2 = arith.constant 0 : index
    %1 = vector.load %arg2[%c0_1, %c0_2] : memref<128x128xf32, #tpu.memory_space<vmem>>, vector<128x128xf32>
    %cst = arith.constant dense<0.000000e+00> : vector<16x128xf32>
    %2 = tpu.matmul %0, %1, %cst {dimension_numbers = #tpu.dot_dimension_numbers<[1], [0], [0], [1], [0, 0, 1, 1], [], []>} : vector<16x128xf32>, vector<128x128xf32>, vector<16x128xf32> -> vector<16x128xf32>
    %c0_3 = arith.constant 0 : index
    %c0_4 = arith.constant 0 : index
    %3 = vector.load %arg3[%c0_3, %c0_4] : memref<16x128xf32, #tpu.memory_space<vmem>>, vector<16x128xf32>
    %4 = arith.addf %2, %3 : vector<16x128xf32>
    %c0_5 = arith.constant 0 : index
    %c0_6 = arith.constant 0 : index
    %5 = vector.load %arg4[%c0_5, %c0_6] : memref<16x128xf32, #tpu.memory_space<vmem>>, vector<16x128xf32>
    tpu.vector_store %arg4[%c0_5, %c0_6], %4 {strides = array<i32>} : memref<16x128xf32, #tpu.memory_space<vmem>>, vector<16x128xf32>,
    return
  }
  func.func @transform_0(%arg0: i32) -> (i32, i32) {
    %c0_i32 = arith.constant 0 : i32
    %c0_i32_0 = arith.constant 0 : i32
    return %arg0, %c0_i32 : i32, i32
  }
  func.func @transform_1(%arg0: i32) -> (i32, i32) {
    %c0_i32 = arith.constant 0 : i32
    %c0_i32_0 = arith.constant 0 : i32
    %c0_i32_1 = arith.constant 0 : i32
    return %c0_i32, %c0_i32_0 : i32, i32
  }
  func.func @transform_2(%arg0: i32) -> (i32, i32) {
    %c0_i32 = arith.constant 0 : i32
    %c0_i32_0 = arith.constant 0 : i32
    %c0_i32_1 = arith.constant 0 : i32
    return %c0_i32, %c0_i32_0 : i32, i32
  }
  func.func @transform_3(%arg0: i32) -> (i32, i32) {
    %c0_i32 = arith.constant 0 : i32
    %c0_i32_0 = arith.constant 0 : i32
    return %arg0, %c0_i32 : i32, i32
  }
}

</mosaic_0001>

<bundles_post_ra>
// kernel: tpu_custom_call.1
= control target key start
LH: loop header
LB: loop body
LE: loop exit
PB: predicated region body
PF: predicated region fallthrough
CT: control target
= control target key end

     0   :  { %8 = vsyncpa [#allocation3], 0  ;;  %s1036_s0 = inlined_call_operand.hbm [shape: f32[32,128], index: 0, kind: input, shape index: {}]   ;;  %s1037_s1 = inlined_call_operand.hbm [shape: f32[128,128], index: 1, kind: input, shape index: {}]   ;;  %s1038_s2 = inlined_call_operand.hbm [shape: f32[16,128], index: 2, kind: input, shape index: {}]   ;;  %s1039_s3 = inlined_call_operand.hbm [shape: f32[32,128], index: 3, kind: output, shape index: {}]  }
   0x1   :  { %10 = vsyncpa [#allocation3 + $0x1], 0 }
   0x2   :  { %11 = vsyncpa [#allocation6], 0 }
   0x3   :  { %12 = vsyncpa [#allocation4], 0 }
   0x4   :  { %14 = vsyncpa [#allocation4 + $0x1], 0  ;;  %s785_s12 = smov 0   ;;  %s787_s13 = smov 0  }
   0x5   :  { %s789_s14 = smov 0   ;;  %s791_s15 = smov 0  }
   0x6 LB: > { %s806_s16 = sadd.s32 4294967295, %s755_s15   ;;  %s423_s17 = sadd.s32 4294967294, %s755_s15   ;;  %s755_s15 = sphi %s791_s15, %s1059_s15   ;;  %s751_s14 = sphi %s789_s14, %s1058_s14   ;;  %s747_s13 = sphi %s787_s13, %s1057_s13   ;;  %s743_s12 = sphi %s785_s12, %s1056_s12  }
   0x7   : > { %p40_p0 = scmp.ne.s32.totalorder %s747_s13, %s743_s12  ;;  %p1040_p1 = scmp.eq.s32.totalorder %s806_s16, 0 }
   0x8   : > { %p112_p3 = scmp.eq.s32.totalorder %s423_s17, 1  ;;  %p424_p5 = scmp.ge.s32.totalorder %s755_s15, 1 }
   0x9   : > { %p815_p4 = por %p1040_p1, %p40_p0  ;;  %p119_p7 = scmp.lt.s32.totalorder %s755_s15, 3 }
   0xa   : > { %p820_p6 = por %p112_p3, %p40_p0  ;;  %s757_s21 = smov [#allocation5]  }
   0xb   : > { %s1043_s18 = scalar_select %p815_p4, 1, 0 }
   0xc   : > { %s1044_s19 = scalar_select %p820_p6, 1, 0 }
   0xd   : > { %p825_p8 = pnand %p424_p5, %p119_p7  ;;  %s131_s22 = sshll.u32 %s757_s21, 4  ;;  %s829_s22 = int_to_ptr.vmem [resolvable:$true] %s131_s22 }
   0xe   : > { %s758_s24 = smov [#allocation7]   ;;  %s599_s28 = scalar_lea.hbm %s1037_s1, 2048 }
   0xf   : > { %p540_p9 = pneg %p825_p8  ;;  %s144_s25 = sshll.u32 %s758_s24, 4  ;;  %s840_s25 = int_to_ptr.vmem [resolvable:$true] %s144_s25 }
  0x10   : > { %p600_p12 = scmp.ne.s32.totalorder %s1037_s1, %s599_s28  ;;  %p606_p5 = scmp.lt.u32.totalorder %s599_s28, %s1037_s1 }
  0x11   : > { %p836_p11 = pnand %p540_p9, %p1040_p1 }
  0x13   : > { %p601_p13 = pneg %p836_p11 }
  0x15   : > { %p602_p0 = pnand %p601_p13, %p600_p12 }
  0x17   : > { %p603_p3 = pneg %p602_p0 }
  0x19   : > { %p608_p7 = pnand %p606_p5, %p603_p3 }
  0x1b   : > { %611 = shalt.err (!%p608_p7)
}
  0x1c   : > { %s612_s6 = scalar_lea.vmem %s829_s22, 2048  ;;  %p620_p2 = scmp.lt.s32.totalorder %s829_s22, %s829_s22 }
  0x1d   : > { %p613_p9 = scmp.ne.s32.totalorder %s829_s22, %s612_s6  ;;  %p621_p12 = scmp.lt.s32.totalorder %s612_s6, %s612_s6 }
  0x1f   : > { %p615_p10 = pnand %p613_p9, %p601_p13  ;;  %p622_p0 = por %p621_p12, %p620_p2 }
  0x21   : > { %p616_p1 = pneg %p615_p10 }
  0x23   : > { %p623_p6 = pnand %p622_p0, %p616_p1 }
  0x25   : > { %626 = shalt.err (!%p623_p6)
}
  0x26   : > { %s759_s7 = smov 128   ;;  %s760_s8 = smov 8  }
  0x27   : > { %543 = dma.hbm_to_vmem [thread:$0]  (!%p836_p11), %s1037_s1, 2048, %s829_s22, [#allocation6], %s759_s7, %s759_s7, %s760_s8  }
  0x28   : > { %s627_s21 = scalar_lea.hbm %s1038_s2, 256 }
  0x29   : > { %p628_p1 = scmp.ne.s32.totalorder %s1038_s2, %s627_s21  ;;  %p634_p10 = scmp.lt.u32.totalorder %s627_s21, %s1038_s2 }
  0x2b   : > { %p630_p2 = pnand %p628_p1, %p601_p13 }
  0x2d   : > { %p631_p6 = pneg %p630_p2 }
  0x2f   : > { %p636_p3 = pnand %p634_p10, %p631_p6 }
  0x31   : > { %639 = shalt.err (!%p636_p3)
}
  0x32   : > { %s640_s22 = scalar_lea.vmem %s840_s25, 256  ;;  %p648_p12 = scmp.lt.s32.totalorder %s840_s25, %s840_s25 }
  0x33   : > { %p641_p5 = scmp.ne.s32.totalorder %s840_s25, %s640_s22  ;;  %p649_p0 = scmp.lt.s32.totalorder %s640_s22, %s640_s22 }
  0x35   : > { %p643_p7 = pnand %p641_p5, %p601_p13  ;;  %p650_p1 = por %p649_p0, %p648_p12 }
  0x37   : > { %p644_p9 = pneg %p643_p7 }
  0x39   : > { %p651_p2 = pnand %p650_p1, %p644_p9 }
  0x3b   : > { %654 = shalt.err (!%p651_p2)
}
  0x3c   : > { %546 = dma.hbm_to_vmem [thread:$0]  (!%p836_p11), %s1038_s2, 256, %s840_s25, [#allocation6], %s759_s7, %s759_s7, %s760_s8  }
  0x3d   : > { %s901_s23 = sadd.s32 1, %s755_s15   ;;  %s27_s4 = sadd.s32 1, %s751_s14 }
  0x3e   : > { %s24_s5 = ssub.s32 %s755_s15, %s901_s23  ;;  %p34_p13 = scmp.ne.s32.totalorder %s751_s14, %s747_s13 }
  0x3f   : > { %p25_p6 = scmp.eq.s32.totalorder %s24_s5, 0  ;;  %p35_p10 = scmp.eq.s32.totalorder %s755_s15, 0 }
  0x40   : > { %p1047_p3 = scmp.eq.s32.totalorder %s806_s16, 1  ;;  %p557_p7 = scmp.lt.s32.totalorder %s755_s15, 2 }
  0x41   : > { %s917_s9 = scalar_select %p25_p6, %s751_s14, %s27_s4  }
  0x42   : > { %p911_p5 = por %p1047_p3, %p34_p13  ;;  %p36_p9 = por %p35_p10, %p34_p13 }
  0x43   : > { %s158_s10 = sand.u32 1, %s751_s14   ;;  %s441_s25 = sshll.u32 %s755_s15, 8 }
  0x44   : > { %s1048_s6 = scalar_select %p911_p5, 1, 0 }
  0x45   : > { %s428_s11 = sshll.u32 %s158_s10, 4  ;;  %s924_s24 = scalar_lea.hbm %s1036_s0, %s441_s25 }
  0x46   : > { %s162_s26 = scalar_lea.vmem [#allocation2], %s428_s11  ;;  %p928_p11 = pnand %p557_p7, %p36_p9 }
  0x47   : > { %s169_s27 = sshll.u32 %s162_s26, 4  ;;  %s932_s22 = scalar_lea.sflag [#allocation3], %s158_s10  ;;  %s926_s27 = int_to_ptr.vmem [resolvable:$true] %s169_s27 }
  0x48   : > { %s655_s29 = scalar_lea.hbm %s924_s24, 256  ;;  %p657_p0 = pneg %p928_p11 }
  0x49   : > { %p656_p12 = scmp.ne.s32.totalorder %s924_s24, %s655_s29  ;;  %s660_s5 = scalar_lea.hbm %s1036_s0, 512 }
  0x4a   : > { %p661_p13 = scmp.lt.u32.totalorder %s924_s24, %s1036_s0  ;;  %p662_p6 = scmp.lt.u32.totalorder %s660_s5, %s655_s29 }
  0x4b   : > { %p658_p1 = pnand %p657_p0, %p656_p12  ;;  %p664_p3 = scmp.lt.u32.totalorder %s655_s29, %s924_s24 }
  0x4c   : > { %p663_p10 = por %p662_p6, %p661_p13 }
  0x4d   : > { %p659_p2 = pneg %p658_p1 }
  0x4e   : > { %p665_p7 = por %p664_p3, %p663_p10 }
  0x50   : > { %p666_p9 = pnand %p665_p7, %p659_p2 }
  0x52   : > { %669 = shalt.err (!%p666_p9)
}
  0x53   : > { %s670_s10 = scalar_lea.vmem %s926_s27, 256  ;;  %s761_s17 = smov [#allocation2]  }
  0x54   : > { %p671_p12 = scmp.ne.s32.totalorder %s926_s27, %s670_s10  ;;  %s675_s21 = sshll.u32 %s761_s17, 4  ;;  %s676_s21 = int_to_ptr.vmem [resolvable:$false] %s675_s21 }
  0x55   : > { %s677_s26 = scalar_lea.vmem %s676_s21, 512  ;;  %p678_p4 = scmp.lt.s32.totalorder %s926_s27, %s676_s21 }
  0x56   : > { %p673_p1 = pnand %p671_p12, %p657_p0  ;;  %p679_p13 = scmp.lt.s32.totalorder %s677_s26, %s670_s10 }
  0x58   : > { %p674_p5 = pneg %p673_p1  ;;  %p680_p6 = por %p679_p13, %p678_p4 }
  0x5a   : > { %p681_p10 = pnand %p680_p6, %p674_p5 }
  0x5c   : > { %684 = shalt.err (!%p681_p10)
}
  0x5d   : > { %550 = dma.hbm_to_vmem [thread:$0]  (!%p928_p11), %s924_s24, 256, %s926_s27, %s932_s22, %s759_s7, %s759_s7, %s760_s8  }
  0x5e   : > { %181 = sbr.rel (%p825_p8) target bundleno = 370 (0x172), region = 32  ;;  %s966_s29 = sand.u32 (!%p825_p8), 1, %s747_s13  }
  0x5f   : > { %s432_s30 = sshll.u32 (!%p825_p8), %s966_s29, 4  ;;  %s184_s4 = scalar_lea.sflag (!%p825_p8), [#allocation3], %s966_s29 }
  0x60   : > { %s972_s28 = scalar_lea.vmem (!%p825_p8), [#allocation2], %s432_s30  ;;  %p1050_p4 = scmp.ne.s32.totalorder (!%p825_p8), %s1043_s18, 0 }
  0x65   : > { %730 = dma.done.wait (%p1050_p4), %s184_s4, 256  }
  0x66   : > { %732 = vsyncadd (%p1050_p4), %s184_s4, 4294967040  ;;  %p1051_p5 = scmp.eq.s32.totalorder %s806_s16, 0 }
  0x68   : > { %734 = dma.done.wait (%p1051_p5), [#allocation6], 2304   ;;  %p1052_p8 = pmov %p1051_p5 }
  0x69   : > { %v222_v0 = vld [vmem:[#allocation5] sm:$0xff]  ;;  %v223_v1 = vld [vmem:[#allocation5 + $0x8] sm:$0xff]  ;;  %v224_v2 = vld [vmem:[#allocation5 + $0x10] sm:$0xff]  ;;  %s217_s18 = scalar_lea.vmem [#allocation8], %s432_s30  ;;  %s442_s7 = sshll.u32 %s806_s16, 8 }
  0x6a   : > { %736 = vsyncadd (%p1052_p8), [#allocation6], 4294964992  ;;  %v496_v3 = vpack.c.bf16 %v223_v1, %v222_v0  ;;  %v225_v4 = vld [vmem:[#allocation5 + $0x18] sm:$0xff]  ;;  %v226_v6 = vld [vmem:[#allocation5 + $0x20] sm:$0xff]  ;;  %s331_s20 = sshll.u32 %s217_s18, 4  ;;  %s992_s27 = scalar_lea.hbm %s1039_s3, %s442_s7  ;;  %s987_s20 = int_to_ptr.vmem [resolvable:$true] %s331_s20 }
  0x6b   : > { %v500_v5 = vpack.c.bf16 %v225_v4, %v224_v2  ;;  %v227_v7 = vld [vmem:[#allocation5 + $0x28] sm:$0xff]  ;;  %v220_v9 = vld [vmem:[%s972_s28] sm:$0xff]  ;;  %v229_v11 = vld [vmem:[#allocation5 + $0x38] sm:$0xff]  ;;  %s318_s22 = scalar_lea.sflag [#allocation4], %s966_s29  ;;  %s685_s5 = scalar_lea.vmem %s987_s20, 256 }
  0x6c   : > { %497 = vmatprep.subr.bf16.mxu0 %v496_v3  ;;  %v504_v8 = vpack.c.bf16 %v227_v7, %v226_v6  ;;  %v228_v10 = vld [vmem:[#allocation5 + $0x30] sm:$0xff]  ;;  %493 = vmatprep.mubr.f32.mxu0 %v220_v9  ;;  %v230_v13 = vld [vmem:[#allocation5 + $0x40] sm:$0xff]  ;;  %v231_v14 = vld [vmem:[#allocation5 + $0x48] sm:$0xff]  ;;  %p686_p11 = scmp.ne.s32.totalorder %s987_s20, %s685_s5  ;;  %p1053_p0 = scmp.ne.s32.totalorder %s1048_s6, 0 }
  0x6d   : > { %499 = vmatpush3.bf16.msra.mxu0 %v496_v3  ;;  %v508_v12 = vpack.c.bf16 %v229_v11, %v228_v10  ;;  %v512_v15 = vpack.c.bf16 %v231_v14, %v230_v13  ;;  %v232_v16 = vld [vmem:[#allocation5 + $0x50] sm:$0xff]  ;;  %v233_v17 = vld [vmem:[#allocation5 + $0x58] sm:$0xff]  ;;  %v234_v19 = vld [vmem:[#allocation5 + $0x60] sm:$0xff]  ;;  %s762_s16 = smov [#allocation8]  }
  0x6e   : > { %501 = vmatprep.subr.bf16.mxu0 %v500_v5  ;;  %v516_v18 = vpack.c.bf16 %v233_v17, %v232_v16  ;;  %v235_v20 = vld [vmem:[#allocation5 + $0x68] sm:$0xff]  ;;  %v236_v22 = vld [vmem:[#allocation5 + $0x70] sm:$0xff]  ;;  %v237_v23 = vld [vmem:[#allocation5 + $0x78] sm:$0xff]  ;;  %p687_p2 = pnand %p686_p11, %p1053_p0  ;;  %s689_s11 = sshll.u32 %s762_s16, 4  ;;  %s690_s11 = int_to_ptr.vmem [resolvable:$false] %s689_s11 }
  0x6f   : > { %v520_v21 = vpack.c.bf16 %v235_v20, %v234_v19  ;;  %v524_v24 = vpack.c.bf16 %v237_v23, %v236_v22  ;;  %v221_v25 = vld [vmem:[%s972_s28 + $0x8] sm:$0xff]  ;;  %v238_v27 = vld [vmem:[#allocation7] sm:$0xff]  ;;  %s691_s25 = scalar_lea.vmem %s690_s11, 512  ;;  %p692_p7 = scmp.lt.s32.totalorder %s987_s20, %s690_s11 }
  0x70   : > { %v239_v26 = vld [vmem:[#allocation7 + $0x8] sm:$0xff]  ;;  %p688_p3 = pneg %p687_p2  ;;  %p693_p9 = scmp.lt.s32.totalorder %s691_s25, %s685_s5 }
  0x71   : > { %503 = vmatpush3.bf16.msra.mxu0 %v500_v5 }
  0x72   : > { %505 = vmatprep.subr.bf16.mxu0 %v504_v8  ;;  %p694_p12 = por %p693_p9, %p692_p7 }
  0x74   : > { %p695_p1 = pnand %p694_p12, %p688_p3 }
  0x75   : > { %507 = vmatpush3.bf16.msra.mxu0 %v504_v8 }
  0x76   : > { %509 = vmatprep.subr.bf16.mxu0 %v508_v12 }
  0x79   : > { %511 = vmatpush3.bf16.msra.mxu0 %v508_v12 }
  0x7a   : > { %513 = vmatprep.subr.bf16.mxu0 %v512_v15 }
  0x7d   : > { %515 = vmatpush3.bf16.msra.mxu0 %v512_v15 }
  0x7e   : > { %517 = vmatprep.subr.bf16.mxu0 %v516_v18 }
  0x81   : > { %519 = vmatpush3.bf16.msra.mxu0 %v516_v18 }
  0x82   : > { %521 = vmatprep.subr.bf16.mxu0 %v520_v21 }
  0x85   : > { %523 = vmatpush3.bf16.msra.mxu0 %v520_v21 }
  0x86   : > { %525 = vmatprep.subr.bf16.mxu0 %v524_v24 }
  0x89   : > { %527 = vmatpush3.bf16.msra.mxu0 %v524_v24 }
  0x8c   : > { %494 = vmatmul.mubr.f32.vlgmr.msra.gmra.mrb[0].mxu0 %v221_v25 }
 0x15f   : > { %v495_v28 = vpop.f32.mrb[0].mxu0 }
 0x160   : > { %v312_v29 = vadd.f32 %v495_v28, %v239_v26  ;;  %v306_v30 = vpop.f32.mrb[1].mxu0 }
 0x161   : > { %v307_v31 = vadd.f32 %v306_v30, %v238_v27 }
 0x162   : > { %316 = vst [vmem:[%s217_s18 + $0x8] sm:$0xff] %v312_v29 }
 0x163   : > { %315 = vst [vmem:[%s217_s18] sm:$0xff] %v307_v31 }
 0x164   : > { %698 = shalt.err (!%p695_p1)
}
 0x165   : > { %s699_s10 = scalar_lea.hbm %s992_s27, 256  ;;  %s703_s26 = scalar_lea.hbm %s1039_s3, 512 }
 0x166   : > { %p700_p13 = scmp.ne.s32.totalorder %s992_s27, %s699_s10  ;;  %p704_p4 = scmp.lt.u32.totalorder %s992_s27, %s1039_s3 }
 0x167   : > { %p705_p5 = scmp.lt.u32.totalorder %s703_s26, %s699_s10  ;;  %p707_p11 = scmp.lt.u32.totalorder %s699_s10, %s992_s27 }
 0x168   : > { %p701_p6 = pnand %p700_p13, %p1053_p0 }
 0x169   : > { %p706_p8 = por %p705_p5, %p704_p4 }
 0x16a   : > { %p702_p10 = pneg %p701_p6 }
 0x16b   : > { %p708_p2 = por %p707_p11, %p706_p8 }
 0x16d   : > { %p709_p3 = pnand %p708_p2, %p702_p10 }
 0x16f   : > { %712 = shalt.err (!%p709_p3)
}
 0x170   : > { %s763_s28 = smov 128   ;;  %s764_s18 = smov 8  }
 0x171   : > { %538 = dma.vmem_to_hbm [thread:$0]  (%p1053_p0), %s987_s20, 256, %s992_s27, %s318_s22, %s763_s28, %s763_s28, %s764_s18  }
 0x172 PF: > { %s346_s7 = sand.u32 1, %s743_s12   ;;  %p1054_p7 = scmp.ne.s32.totalorder %s1044_s19, 0 }
 0x173   : > { %p1055_p9 = scmp.ge.s32.totalorder %s755_s15, 2  ;;  %s347_s8 = scalar_lea.sflag [#allocation4], %s346_s7 }
 0x175   : > { %p552_p12 = pnand %p1055_p9, %p1054_p7 }
 0x177   : > { %738 = dma.done.wait (!%p552_p12), %s347_s8, 256  }
 0x178   : > { %740 = vsyncadd (!%p552_p12), %s347_s8, 4294967040  ;;  %p17_p1 = scmp.ge.s32.totalorder %s901_s23, 4   ;;  %s1056_s12 = smov %s747_s13 }
 0x179   : > { %s1057_s13 = smov %s751_s14  ;;  %s1058_s14 = smov %s917_s9 }
 0x17a   : > { %s1059_s15 = smov %s901_s23  ;;  %19 = sbr.rel (!%p17_p1) target bundleno = 6 (0x6), region = 85 }
 0x181   :  { %352 = vsyncpa [#allocation3], 1 }
 0x182   :  { %354 = vsyncpa [#allocation3 + $0x1], 1 }
 0x183   :  { %355 = vsyncpa [#allocation6], 1 }
 0x184   :  { %356 = vsyncpa [#allocation4], 1 }
 0x185   :  { %358 = vsyncpa [#allocation4 + $0x1], 1 }

// kernel: tpu_custom_call.1
= control target key start
LH: loop header
LB: loop body
LE: loop exit
PB: predicated region body
PF: predicated region fallthrough
CT: control target
= control target key end

     0   :  { %8 = vsyncpa [#allocation3], 0  ;;  %s1036_s0 = inlined_call_operand.hbm [shape: f32[32,128], index: 0, kind: input, shape index: {}]   ;;  %s1037_s1 = inlined_call_operand.hbm [shape: f32[128,128], index: 1, kind: input, shape index: {}]   ;;  %s1038_s2 = inlined_call_operand.hbm [shape: f32[16,128], index: 2, kind: input, shape index: {}]   ;;  %s1039_s3 = inlined_call_operand.hbm [shape: f32[32,128], index: 3, kind: output, shape index: {}]  }
   0x1   :  { %10 = vsyncpa [#allocation3 + $0x1], 0 }
   0x2   :  { %11 = vsyncpa [#allocation6], 0 }
   0x3   :  { %12 = vsyncpa [#allocation4], 0 }
   0x4   :  { %14 = vsyncpa [#allocation4 + $0x1], 0  ;;  %s785_s12 = smov 0   ;;  %s787_s13 = smov 0  }
   0x5   :  { %s789_s14 = smov 0   ;;  %s791_s15 = smov 0  }
   0x6 LB: > { %s806_s16 = sadd.s32 4294967295, %s755_s15   ;;  %s423_s17 = sadd.s32 4294967294, %s755_s15   ;;  %s755_s15 = sphi %s791_s15, %s1059_s15   ;;  %s751_s14 = sphi %s789_s14, %s1058_s14   ;;  %s747_s13 = sphi %s787_s13, %s1057_s13   ;;  %s743_s12 = sphi %s785_s12, %s1056_s12  }
   0x7   : > { %p40_p0 = scmp.ne.s32.totalorder %s747_s13, %s743_s12  ;;  %p1040_p1 = scmp.eq.s32.totalorder %s806_s16, 0 }
   0x8   : > { %p112_p3 = scmp.eq.s32.totalorder %s423_s17, 1  ;;  %p424_p5 = scmp.ge.s32.totalorder %s755_s15, 1 }
   0x9   : > { %p815_p4 = por %p1040_p1, %p40_p0  ;;  %p119_p7 = scmp.lt.s32.totalorder %s755_s15, 3 }
   0xa   : > { %p820_p6 = por %p112_p3, %p40_p0  ;;  %s757_s21 = smov [#allocation5]  }
   0xb   : > { %s1043_s18 = scalar_select %p815_p4, 1, 0 }
   0xc   : > { %s1044_s19 = scalar_select %p820_p6, 1, 0 }
   0xd   : > { %p825_p8 = pnand %p424_p5, %p119_p7  ;;  %s131_s22 = sshll.u32 %s757_s21, 4  ;;  %s829_s22 = int_to_ptr.vmem [resolvable:$true] %s131_s22 }
   0xe   : > { %s758_s24 = smov [#allocation7]   ;;  %s599_s28 = scalar_lea.hbm %s1037_s1, 2048 }
   0xf   : > { %p540_p9 = pneg %p825_p8  ;;  %s144_s25 = sshll.u32 %s758_s24, 4  ;;  %s840_s25 = int_to_ptr.vmem [resolvable:$true] %s144_s25 }
  0x10   : > { %p600_p12 = scmp.ne.s32.totalorder %s1037_s1, %s599_s28  ;;  %p606_p5 = scmp.lt.u32.totalorder %s599_s28, %s1037_s1 }
  0x11   : > { %p836_p11 = pnand %p540_p9, %p1040_p1 }
  0x13   : > { %p601_p13 = pneg %p836_p11 }
  0x15   : > { %p602_p0 = pnand %p601_p13, %p600_p12 }
  0x17   : > { %p603_p3 = pneg %p602_p0 }
  0x19   : > { %p608_p7 = pnand %p606_p5, %p603_p3 }
  0x1b   : > { %611 = shalt.err (!%p608_p7)
}
  0x1c   : > { %s612_s6 = scalar_lea.vmem %s829_s22, 2048  ;;  %p620_p2 = scmp.lt.s32.totalorder %s829_s22, %s829_s22 }
  0x1d   : > { %p613_p9 = scmp.ne.s32.totalorder %s829_s22, %s612_s6  ;;  %p621_p12 = scmp.lt.s32.totalorder %s612_s6, %s612_s6 }
  0x1f   : > { %p615_p10 = pnand %p613_p9, %p601_p13  ;;  %p622_p0 = por %p621_p12, %p620_p2 }
  0x21   : > { %p616_p1 = pneg %p615_p10 }
  0x23   : > { %p623_p6 = pnand %p622_p0, %p616_p1 }
  0x25   : > { %626 = shalt.err (!%p623_p6)
}
  0x26   : > { %s759_s7 = smov 128   ;;  %s760_s8 = smov 8  }
  0x27   : > { %543 = dma.hbm_to_vmem [thread:$0]  (!%p836_p11), %s1037_s1, 2048, %s829_s22, [#allocation6], %s759_s7, %s759_s7, %s760_s8  }
  0x28   : > { %s627_s21 = scalar_lea.hbm %s1038_s2, 256 }
  0x29   : > { %p628_p1 = scmp.ne.s32.totalorder %s1038_s2, %s627_s21  ;;  %p634_p10 = scmp.lt.u32.totalorder %s627_s21, %s1038_s2 }
  0x2b   : > { %p630_p2 = pnand %p628_p1, %p601_p13 }
  0x2d   : > { %p631_p6 = pneg %p630_p2 }
  0x2f   : > { %p636_p3 = pnand %p634_p10, %p631_p6 }
  0x31   : > { %639 = shalt.err (!%p636_p3)
}
  0x32   : > { %s640_s22 = scalar_lea.vmem %s840_s25, 256  ;;  %p648_p12 = scmp.lt.s32.totalorder %s840_s25, %s840_s25 }
  0x33   : > { %p641_p5 = scmp.ne.s32.totalorder %s840_s25, %s640_s22  ;;  %p649_p0 = scmp.lt.s32.totalorder %s640_s22, %s640_s22 }
  0x35   : > { %p643_p7 = pnand %p641_p5, %p601_p13  ;;  %p650_p1 = por %p649_p0, %p648_p12 }
  0x37   : > { %p644_p9 = pneg %p643_p7 }
  0x39   : > { %p651_p2 = pnand %p650_p1, %p644_p9 }
  0x3b   : > { %654 = shalt.err (!%p651_p2)
}
  0x3c   : > { %546 = dma.hbm_to_vmem [thread:$0]  (!%p836_p11), %s1038_s2, 256, %s840_s25, [#allocation6], %s759_s7, %s759_s7, %s760_s8  }
  0x3d   : > { %s901_s23 = sadd.s32 1, %s755_s15   ;;  %s27_s4 = sadd.s32 1, %s751_s14 }
  0x3e   : > { %s24_s5 = ssub.s32 %s755_s15, %s901_s23  ;;  %p34_p13 = scmp.ne.s32.totalorder %s751_s14, %s747_s13 }
  0x3f   : > { %p25_p6 = scmp.eq.s32.totalorder %s24_s5, 0  ;;  %p35_p10 = scmp.eq.s32.totalorder %s755_s15, 0 }
  0x40   : > { %p1047_p3 = scmp.eq.s32.totalorder %s806_s16, 1  ;;  %p557_p7 = scmp.lt.s32.totalorder %s755_s15, 2 }
  0x41   : > { %s917_s9 = scalar_select %p25_p6, %s751_s14, %s27_s4  }
  0x42   : > { %p911_p5 = por %p1047_p3, %p34_p13  ;;  %p36_p9 = por %p35_p10, %p34_p13 }
  0x43   : > { %s158_s10 = sand.u32 1, %s751_s14   ;;  %s441_s25 = sshll.u32 %s755_s15, 8 }
  0x44   : > { %s1048_s6 = scalar_select %p911_p5, 1, 0 }
  0x45   : > { %s428_s11 = sshll.u32 %s158_s10, 4  ;;  %s924_s24 = scalar_lea.hbm %s1036_s0, %s441_s25 }
  0x46   : > { %s162_s26 = scalar_lea.vmem [#allocation2], %s428_s11  ;;  %p928_p11 = pnand %p557_p7, %p36_p9 }
  0x47   : > { %s169_s27 = sshll.u32 %s162_s26, 4  ;;  %s932_s22 = scalar_lea.sflag [#allocation3], %s158_s10  ;;  %s926_s27 = int_to_ptr.vmem [resolvable:$true] %s169_s27 }
  0x48   : > { %s655_s29 = scalar_lea.hbm %s924_s24, 256  ;;  %p657_p0 = pneg %p928_p11 }
  0x49   : > { %p656_p12 = scmp.ne.s32.totalorder %s924_s24, %s655_s29  ;;  %s660_s5 = scalar_lea.hbm %s1036_s0, 512 }
  0x4a   : > { %p661_p13 = scmp.lt.u32.totalorder %s924_s24, %s1036_s0  ;;  %p662_p6 = scmp.lt.u32.totalorder %s660_s5, %s655_s29 }
  0x4b   : > { %p658_p1 = pnand %p657_p0, %p656_p12  ;;  %p664_p3 = scmp.lt.u32.totalorder %s655_s29, %s924_s24 }
  0x4c   : > { %p663_p10 = por %p662_p6, %p661_p13 }
  0x4d   : > { %p659_p2 = pneg %p658_p1 }
  0x4e   : > { %p665_p7 = por %p664_p3, %p663_p10 }
  0x50   : > { %p666_p9 = pnand %p665_p7, %p659_p2 }
  0x52   : > { %669 = shalt.err (!%p666_p9)
}
  0x53   : > { %s670_s10 = scalar_lea.vmem %s926_s27, 256  ;;  %s761_s17 = smov [#allocation2]  }
  0x54   : > { %p671_p12 = scmp.ne.s32.totalorder %s926_s27, %s670_s10  ;;  %s675_s21 = sshll.u32 %s761_s17, 4  ;;  %s676_s21 = int_to_ptr.vmem [resolvable:$false] %s675_s21 }
  0x55   : > { %s677_s26 = scalar_lea.vmem %s676_s21, 512  ;;  %p678_p4 = scmp.lt.s32.totalorder %s926_s27, %s676_s21 }
  0x56   : > { %p673_p1 = pnand %p671_p12, %p657_p0  ;;  %p679_p13 = scmp.lt.s32.totalorder %s677_s26, %s670_s10 }
  0x58   : > { %p674_p5 = pneg %p673_p1  ;;  %p680_p6 = por %p679_p13, %p678_p4 }
  0x5a   : > { %p681_p10 = pnand %p680_p6, %p674_p5 }
  0x5c   : > { %684 = shalt.err (!%p681_p10)
}
  0x5d   : > { %550 = dma.hbm_to_vmem [thread:$0]  (!%p928_p11), %s924_s24, 256, %s926_s27, %s932_s22, %s759_s7, %s759_s7, %s760_s8  }
  0x5e   : > { %181 = sbr.rel (%p825_p8) target bundleno = 370 (0x172), region = 32  ;;  %s966_s29 = sand.u32 (!%p825_p8), 1, %s747_s13  }
  0x5f   : > { %s432_s30 = sshll.u32 (!%p825_p8), %s966_s29, 4  ;;  %s184_s4 = scalar_lea.sflag (!%p825_p8), [#allocation3], %s966_s29 }
  0x60   : > { %s972_s28 = scalar_lea.vmem (!%p825_p8), [#allocation2], %s432_s30  ;;  %p1050_p4 = scmp.ne.s32.totalorder (!%p825_p8), %s1043_s18, 0 }
  0x65   : > { %730 = dma.done.wait (%p1050_p4), %s184_s4, 256  }
  0x66   : > { %732 = vsyncadd (%p1050_p4), %s184_s4, 4294967040  ;;  %p1051_p5 = scmp.eq.s32.totalorder %s806_s16, 0 }
  0x68   : > { %734 = dma.done.wait (%p1051_p5), [#allocation6], 2304   ;;  %p1052_p8 = pmov %p1051_p5 }
  0x69   : > { %v222_v0 = vld [vmem:[#allocation5] sm:$0xff]  ;;  %v223_v1 = vld [vmem:[#allocation5 + $0x8] sm:$0xff]  ;;  %v224_v2 = vld [vmem:[#allocation5 + $0x10] sm:$0xff]  ;;  %s217_s18 = scalar_lea.vmem [#allocation8], %s432_s30  ;;  %s442_s7 = sshll.u32 %s806_s16, 8 }
  0x6a   : > { %736 = vsyncadd (%p1052_p8), [#allocation6], 4294964992  ;;  %v496_v3 = vpack.c.bf16 %v223_v1, %v222_v0  ;;  %v225_v4 = vld [vmem:[#allocation5 + $0x18] sm:$0xff]  ;;  %v226_v6 = vld [vmem:[#allocation5 + $0x20] sm:$0xff]  ;;  %s331_s20 = sshll.u32 %s217_s18, 4  ;;  %s992_s27 = scalar_lea.hbm %s1039_s3, %s442_s7  ;;  %s987_s20 = int_to_ptr.vmem [resolvable:$true] %s331_s20 }
  0x6b   : > { %v500_v5 = vpack.c.bf16 %v225_v4, %v224_v2  ;;  %v227_v7 = vld [vmem:[#allocation5 + $0x28] sm:$0xff]  ;;  %v220_v9 = vld [vmem:[%s972_s28] sm:$0xff]  ;;  %v229_v11 = vld [vmem:[#allocation5 + $0x38] sm:$0xff]  ;;  %s318_s22 = scalar_lea.sflag [#allocation4], %s966_s29  ;;  %s685_s5 = scalar_lea.vmem %s987_s20, 256 }
  0x6c   : > { %497 = vmatprep.subr.bf16.mxu0 %v496_v3  ;;  %v504_v8 = vpack.c.bf16 %v227_v7, %v226_v6  ;;  %v228_v10 = vld [vmem:[#allocation5 + $0x30] sm:$0xff]  ;;  %493 = vmatprep.mubr.f32.mxu0 %v220_v9  ;;  %v230_v13 = vld [vmem:[#allocation5 + $0x40] sm:$0xff]  ;;  %v231_v14 = vld [vmem:[#allocation5 + $0x48] sm:$0xff]  ;;  %p686_p11 = scmp.ne.s32.totalorder %s987_s20, %s685_s5  ;;  %p1053_p0 = scmp.ne.s32.totalorder %s1048_s6, 0 }
  0x6d   : > { %499 = vmatpush3.bf16.msra.mxu0 %v496_v3  ;;  %v508_v12 = vpack.c.bf16 %v229_v11, %v228_v10  ;;  %v512_v15 = vpack.c.bf16 %v231_v14, %v230_v13  ;;  %v232_v16 = vld [vmem:[#allocation5 + $0x50] sm:$0xff]  ;;  %v233_v17 = vld [vmem:[#allocation5 + $0x58] sm:$0xff]  ;;  %v234_v19 = vld [vmem:[#allocation5 + $0x60] sm:$0xff]  ;;  %s762_s16 = smov [#allocation8]  }
  0x6e   : > { %501 = vmatprep.subr.bf16.mxu0 %v500_v5  ;;  %v516_v18 = vpack.c.bf16 %v233_v17, %v232_v16  ;;  %v235_v20 = vld [vmem:[#allocation5 + $0x68] sm:$0xff]  ;;  %v236_v22 = vld [vmem:[#allocation5 + $0x70] sm:$0xff]  ;;  %v237_v23 = vld [vmem:[#allocation5 + $0x78] sm:$0xff]  ;;  %p687_p2 = pnand %p686_p11, %p1053_p0  ;;  %s689_s11 = sshll.u32 %s762_s16, 4  ;;  %s690_s11 = int_to_ptr.vmem [resolvable:$false] %s689_s11 }
  0x6f   : > { %v520_v21 = vpack.c.bf16 %v235_v20, %v234_v19  ;;  %v524_v24 = vpack.c.bf16 %v237_v23, %v236_v22  ;;  %v221_v25 = vld [vmem:[%s972_s28 + $0x8] sm:$0xff]  ;;  %v238_v27 = vld [vmem:[#allocation7] sm:$0xff]  ;;  %s691_s25 = scalar_lea.vmem %s690_s11, 512  ;;  %p692_p7 = scmp.lt.s32.totalorder %s987_s20, %s690_s11 }
  0x70   : > { %v239_v26 = vld [vmem:[#allocation7 + $0x8] sm:$0xff]  ;;  %p688_p3 = pneg %p687_p2  ;;  %p693_p9 = scmp.lt.s32.totalorder %s691_s25, %s685_s5 }
  0x71   : > { %503 = vmatpush3.bf16.msra.mxu0 %v500_v5 }
  0x72   : > { %505 = vmatprep.subr.bf16.mxu0 %v504_v8  ;;  %p694_p12 = por %p693_p9, %p692_p7 }
  0x74   : > { %p695_p1 = pnand %p694_p12, %p688_p3 }
  0x75   : > { %507 = vmatpush3.bf16.msra.mxu0 %v504_v8 }
  0x76   : > { %509 = vmatprep.subr.bf16.mxu0 %v508_v12 }
  0x79   : > { %511 = vmatpush3.bf16.msra.mxu0 %v508_v12 }
  0x7a   : > { %513 = vmatprep.subr.bf16.mxu0 %v512_v15 }
  0x7d   : > { %515 = vmatpush3.bf16.msra.mxu0 %v512_v15 }
  0x7e   : > { %517 = vmatprep.subr.bf16.mxu0 %v516_v18 }
  0x81   : > { %519 = vmatpush3.bf16.msra.mxu0 %v516_v18 }
  0x82   : > { %521 = vmatprep.subr.bf16.mxu0 %v520_v21 }
  0x85   : > { %523 = vmatpush3.bf16.msra.mxu0 %v520_v21 }
  0x86   : > { %525 = vmatprep.subr.bf16.mxu0 %v524_v24 }
  0x89   : > { %527 = vmatpush3.bf16.msra.mxu0 %v524_v24 }
  0x8c   : > { %494 = vmatmul.mubr.f32.vlgmr.msra.gmra.mrb[0].mxu0 %v221_v25 }
 0x15f   : > { %v495_v28 = vpop.f32.mrb[0].mxu0 }
 0x160   : > { %v312_v29 = vadd.f32 %v495_v28, %v239_v26  ;;  %v306_v30 = vpop.f32.mrb[1].mxu0 }
 0x161   : > { %v307_v31 = vadd.f32 %v306_v30, %v238_v27 }
 0x162   : > { %316 = vst [vmem:[%s217_s18 + $0x8] sm:$0xff] %v312_v29 }
 0x163   : > { %315 = vst [vmem:[%s217_s18] sm:$0xff] %v307_v31 }
 0x164   : > { %698 = shalt.err (!%p695_p1)
}
 0x165   : > { %s699_s10 = scalar_lea.hbm %s992_s27, 256  ;;  %s703_s26 = scalar_lea.hbm %s1039_s3, 512 }
 0x166   : > { %p700_p13 = scmp.ne.s32.totalorder %s992_s27, %s699_s10  ;;  %p704_p4 = scmp.lt.u32.totalorder %s992_s27, %s1039_s3 }
 0x167   : > { %p705_p5 = scmp.lt.u32.totalorder %s703_s26, %s699_s10  ;;  %p707_p11 = scmp.lt.u32.totalorder %s699_s10, %s992_s27 }
 0x168   : > { %p701_p6 = pnand %p700_p13, %p1053_p0 }
 0x169   : > { %p706_p8 = por %p705_p5, %p704_p4 }
 0x16a   : > { %p702_p10 = pneg %p701_p6 }
 0x16b   : > { %p708_p2 = por %p707_p11, %p706_p8 }
 0x16d   : > { %p709_p3 = pnand %p708_p2, %p702_p10 }
 0x16f   : > { %712 = shalt.err (!%p709_p3)
}
 0x170   : > { %s763_s28 = smov 128   ;;  %s764_s18 = smov 8  }
 0x171   : > { %538 = dma.vmem_to_hbm [thread:$0]  (%p1053_p0), %s987_s20, 256, %s992_s27, %s318_s22, %s763_s28, %s763_s28, %s764_s18  }
 0x172 PF: > { %s346_s7 = sand.u32 1, %s743_s12   ;;  %p1054_p7 = scmp.ne.s32.totalorder %s1044_s19, 0 }
 0x173   : > { %p1055_p9 = scmp.ge.s32.totalorder %s755_s15, 2  ;;  %s347_s8 = scalar_lea.sflag [#allocation4], %s346_s7 }
 0x175   : > { %p552_p12 = pnand %p1055_p9, %p1054_p7 }
 0x177   : > { %738 = dma.done.wait (!%p552_p12), %s347_s8, 256  }
 0x178   : > { %740 = vsyncadd (!%p552_p12), %s347_s8, 4294967040  ;;  %p17_p1 = scmp.ge.s32.totalorder %s901_s23, 4   ;;  %s1056_s12 = smov %s747_s13 }
 0x179   : > { %s1057_s13 = smov %s751_s14  ;;  %s1058_s14 = smov %s917_s9 }
 0x17a   : > { %s1059_s15 = smov %s901_s23  ;;  %19 = sbr.rel (!%p17_p1) target bundleno = 6 (0x6), region = 85 }
 0x181   :  { %352 = vsyncpa [#allocation3], 1 }
 0x182   :  { %354 = vsyncpa [#allocation3 + $0x1], 1 }
 0x183   :  { %355 = vsyncpa [#allocation6], 1 }
 0x184   :  { %356 = vsyncpa [#allocation4], 1 }
 0x185   :  { %358 = vsyncpa [#allocation4 + $0x1], 1 }

</bundles_post_ra>
